<compile_context>
chip_gen: v7x
topology: tpu7x:2x2x1
jax: 0.10.0
libtpu: 0.0.40
codegen_flags: <defaults>
</compile_context>

<pallas_src>
import jax
import jax.numpy as jnp
from jax.experimental import pallas as pl
from jax.experimental.pallas import tpu as pltpu


def _round_up(n, m):
    return ((n + m - 1) // m) * m


def _choose_batch_tile(batch):
    """Split the batch into ~2 tiles (both TCs busy on v7x), cap tile at 512 rows."""
    b8 = _round_up(max(int(batch), 8), 8)
    half = _round_up((b8 + 1) // 2, 8)
    return max(8, min(512, half))


def _make_kernel(dropout_fraction):
    """Fused FFNN kernel for a fixed (compile-time) dropout fraction."""
    p = float(dropout_fraction)
    use_dropout = p > 0.0
    keep = min(max(1.0 - p, 0.0), 1.0)
    thr = int(round(keep * (1 << 24)))          # integer-domain keep threshold

    # murmur3-style mixing constants (as uint32)
    C1, C2, C3 = 0x9E3779B1, 0x85EBCA6B, 0xC2B2AE35

    def keep_mask(shape, row0, seed_u32, salt):
        # counter-based hash PRNG: unique (global_row, col, salt, seed) -> 24 bits
        rows = (jax.lax.broadcasted_iota(jnp.int32, shape, 0) + row0).astype(jnp.uint32)
        cols = jax.lax.broadcasted_iota(jnp.int32, shape, 1).astype(jnp.uint32)
        h = rows * jnp.uint32(C1) + cols * jnp.uint32(C2)
        h = h ^ ((seed_u32 + jnp.uint32(salt)) * jnp.uint32(C3))
        h = h ^ (h >> 16)
        h = h * jnp.uint32(C2)
        h = h ^ (h >> 13)
        h = h * jnp.uint32(C3)
        h = h ^ (h >> 16)
        return (h & jnp.uint32(0x00FFFFFF)) < jnp.uint32(thr)

    def kernel(seed_ref,                      # scalar prefetch (SMEM)
               x_ref,                         # (TB, Din)   bf16
               w1_ref, b1_ref,                # (Din, H1p)  bf16, (1, H1p)   f32
               w2_ref, b2_ref,                # (H1p, H2p)  bf16, (1, H2p)   f32
               w3_ref, b3_ref,                # (H2p, Doutp)bf16, (1, Doutp) f32
               o_ref):                        # (TB, Doutp) f32
        if use_dropout:
            seed_u32 = seed_ref[0].astype(jnp.uint32)
            row0 = pl.program_id(0) * x_ref.shape[0]

        x = x_ref[...]                                            # bf16
        if use_dropout:
            x = jnp.where(keep_mask(x.shape, row0, seed_u32, 1), x, jnp.zeros_like(x))

        # fc1 (+ fused ReLU/dropout) -- bf16 MXU operands, f32 accumulate
        h1 = jnp.dot(x, w1_ref[...], preferred_element_type=jnp.float32) + b1_ref[...]
        if use_dropout:
            h1 = jnp.where(keep_mask(h1.shape, row0, seed_u32, 2) & (h1 > 0.0), h1, 0.0)
        else:
            h1 = jnp.maximum(h1, 0.0)

        # fc2 (+ fused ReLU/dropout)
        h2 = jnp.dot(h1.astype(jnp.bfloat16), w2_ref[...],
                     preferred_element_type=jnp.float32) + b2_ref[...]
        if use_dropout:
            h2 = jnp.where(keep_mask(h2.shape, row0, seed_u32, 3) & (h2 > 0.0), h2, 0.0)
        else:
            h2 = jnp.maximum(h2, 0.0)

        # fc3 -- lane-dense (padded-to-128) store
        o_ref[...] = (jnp.dot(h2.astype(jnp.bfloat16), w3_ref[...],
                              preferred_element_type=jnp.float32)
                      + b3_ref[...]).astype(o_ref.dtype)

    return kernel


def prepare_params(params, dropout_fraction):
    """One-time padding/cast of weights; folds the 1/(1-p) dropout scale into the
    downstream weights so the kernel's dropout is a pure select-to-zero."""
    p = float(dropout_fraction)
    keep = 1.0 - p
    inv = (1.0 / keep) if keep > 0.0 else 0.0   # p == 1: everything dropped anyway

    w1t, b1 = params["w1t"], params["b1"]
    w2t, b2 = params["w2t"], params["b2"]
    w3t, b3 = params["w3t"], params["b3"]

    d_in, h1 = w1t.shape
    h2 = w2t.shape[1]
    d_out = w3t.shape[1]
    h1_p = _round_up(h1, 128)
    h2_p = _round_up(h2, 128)
    d_out_p = _round_up(d_out, 128)

    w1p = jnp.zeros((d_in, h1_p), jnp.bfloat16).at[:, :h1].set((inv * w1t).astype(jnp.bfloat16))
    b1p = jnp.zeros((1, h1_p), jnp.float32).at[:, :h1].set(b1)
    w2p = jnp.zeros((h1_p, h2_p), jnp.bfloat16).at[:h1, :h2].set((inv * w2t).astype(jnp.bfloat16))
    b2p = jnp.zeros((1, h2_p), jnp.float32).at[:, :h2].set(b2)
    w3p = jnp.zeros((h2_p, d_out_p), jnp.bfloat16).at[:h2, :d_out].set((inv * w3t).astype(jnp.bfloat16))
    b3p = jnp.zeros((1, d_out_p), jnp.float32).at[:, :d_out].set(b3)

    return dict(w1p=w1p, b1p=b1p, w2p=w2p, b2p=b2p, w3p=w3p, b3p=b3p,
                d_in=d_in, d_out=d_out)


def ffnn_forward(x, prepared, dropout_fraction, seed, *, batch_tile=None):
    """x: [B, input_dim] f32. `prepared` from prepare_params(). Training-mode
    inverted dropout (masks generated in-kernel, scale pre-folded into weights)."""
    w1p, b1p = prepared["w1p"], prepared["b1p"]
    w2p, b2p = prepared["w2p"], prepared["b2p"]
    w3p, b3p = prepared["w3p"], prepared["b3p"]

    B, d_in = x.shape
    assert d_in == prepared["d_in"]
    d_out = prepared["d_out"]
    h1_p = w1p.shape[1]
    h2_p = w2p.shape[1]
    d_out_p = w3p.shape[1]

    if batch_tile is None:
        batch_tile = _choose_batch_tile(B)
    b_p = _round_up(B, batch_tile)
    num_tiles = b_p // batch_tile

    # x streamed as bf16 (halves the dominant HBM input); last dim left natural.
    x_p = jnp.zeros((b_p, d_in), jnp.bfloat16).at[:B].set(x.astype(jnp.bfloat16))
    seed_arr = jnp.asarray([seed], jnp.int32)

    tiled = lambda i, seed_ref: (i, 0)   # batch-tiled activations / output
    const = lambda i, seed_ref: (0, 0)   # VMEM-resident weights / biases

    grid_spec = pltpu.PrefetchScalarGridSpec(
        num_scalar_prefetch=1,
        grid=(num_tiles,),
        in_specs=[
            pl.BlockSpec((batch_tile, d_in), tiled),
            pl.BlockSpec((d_in, h1_p), const),
            pl.BlockSpec((1, h1_p), const),
            pl.BlockSpec((h1_p, h2_p), const),
            pl.BlockSpec((1, h2_p), const),
            pl.BlockSpec((h2_p, d_out_p), const),
            pl.BlockSpec((1, d_out_p), const),
        ],
        out_specs=pl.BlockSpec((batch_tile, d_out_p), tiled),
    )

    # Tight VMEM budget: double-buffered weights/biases + x/out tiles, 2x headroom,
    # capped well under v7x's 64 MiB physical.
    bytes_needed = 2 * (
        (w1p.size + w2p.size + w3p.size) * 2
        + (b1p.size + b2p.size + b3p.size) * 4
        + batch_tile * d_in * 2
        + batch_tile * d_out_p * 4)
    vmem_limit = int(min(48 * 1024 * 1024, max(16 * 1024 * 1024, 2 * bytes_needed)))

    out_p = pl.pallas_call(
        _make_kernel(dropout_fraction),
        out_shape=jax.ShapeDtypeStruct((b_p, d_out_p), jnp.float32),
        grid_spec=grid_spec,
        compiler_params=pltpu.CompilerParams(
            dimension_semantics=("parallel",),   # shard batch tiles across TCs (v7x)
            vmem_limit_bytes=vmem_limit,
        ),
    )(seed_arr, x_p, w1p, b1p, w2p, b2p, w3p, b3p)

    return out_p[:B, :d_out]


def make_params(key, input_dim, n_units1, n_units2, output_dim):
    """Deterministic synthetic init (PyTorch Linear-style uniform ranges)."""
    ks = jax.random.split(key, 6)

    def linear(kw, kb, fan_in, fan_out):
        bound = 1.0 / jnp.sqrt(fan_in)
        w_t = jax.random.uniform(kw, (fan_in, fan_out), jnp.float32, -bound, bound)
        b = jax.random.uniform(kb, (1, fan_out), jnp.float32, -bound, bound)
        return w_t, b

    w1t, b1 = linear(ks[0], ks[1], input_dim, n_units1)
    w2t, b2 = linear(ks[2], ks[3], n_units1, n_units2)
    w3t, b3 = linear(ks[4], ks[5], n_units2, output_dim)
    return dict(w1t=w1t, b1=b1, w2t=w2t, b2=b2, w3t=w3t, b3=b3)


def ffnn_reference_no_dropout(x, params):
    """Pure-JAX reference with the same bf16-MXU / f32-accumulate numerics, p = 0."""
    w1 = params["w1t"].astype(jnp.bfloat16)
    w2 = params["w2t"].astype(jnp.bfloat16)
    w3 = params["w3t"].astype(jnp.bfloat16)
    h = jnp.dot(x.astype(jnp.bfloat16), w1, preferred_element_type=jnp.float32) + params["b1"]
    h = jnp.maximum(h, 0.0)
    h = jnp.dot(h.astype(jnp.bfloat16), w2, preferred_element_type=jnp.float32) + params["b2"]
    h = jnp.maximum(h, 0.0)
    return jnp.dot(h.astype(jnp.bfloat16), w3, preferred_element_type=jnp.float32) + params["b3"]


if __name__ == "__main__":
    # Small, module-consistent (deliberately non-128-aligned) shapes:
    # FFNN(input_dim, output_dim, n_units1, n_units2, p, 'ReLU')
    B, input_dim, n_units1, n_units2, output_dim = 200, 200, 100, 96, 50
    dropout_fraction = 0.1

    root = jax.random.PRNGKey(0)
    k_x, k_p = jax.random.split(root, 2)

    x = jax.random.normal(k_x, (B, input_dim), jnp.float32)
    params = make_params(k_p, input_dim, n_units1, n_units2, output_dim)

    # 1) Numerics check with dropout disabled (deterministic path).
    prep0 = prepare_params(params, 0.0)
    out_nodrop = jax.block_until_ready(ffnn_forward(x, prep0, 0.0, seed=0))
    ref = ffnn_reference_no_dropout(x, params)
    assert out_nodrop.shape == (B, output_dim)
    assert jnp.allclose(out_nodrop, ref, atol=2e-2, rtol=2e-2), "mismatch vs. reference (p=0)"

    # 2) Training-mode dropout path (in-kernel hash PRNG): structural checks.
    prep_d = prepare_params(params, dropout_fraction)
    out_drop = jax.block_until_ready(ffnn_forward(x, prep_d, dropout_fraction, seed=1234))
    assert out_drop.shape == (B, output_dim)
    assert bool(jnp.all(jnp.isfinite(out_drop)))
    assert not bool(jnp.allclose(out_drop, out_nodrop)), "dropout had no effect"
    out_drop2 = jax.block_until_ready(ffnn_forward(x, prep_d, dropout_fraction, seed=1234))
    assert bool(jnp.allclose(out_drop, out_drop2)), "same seed should reproduce the same mask"

    # 3) p = 1.0 drops everything upstream of fc3 -> each output row equals b3.
    prep1 = prepare_params(params, 1.0)
    out_p1 = jax.block_until_ready(ffnn_forward(x, prep1, 1.0, seed=7))
    assert bool(jnp.allclose(out_p1, jnp.broadcast_to(params["b3"], (B, output_dim)), atol=1e-6))

    print("KERNEL_OK")
</pallas_src>

<mosaic_0001>
module attributes {stable_mosaic.version = 11 : i64} {
  func.func @kernel(%arg0: i32, %arg1: memref<1xi32, #tpu.memory_space<smem>>, %arg2: memref<104x200xbf16, #tpu.memory_space<vmem>>, %arg3: memref<200x128xbf16, #tpu.memory_space<vmem>>, %arg4: memref<1x128xf32, #tpu.memory_space<vmem>>, %arg5: memref<128x128xbf16, #tpu.memory_space<vmem>>, %arg6: memref<1x128xf32, #tpu.memory_space<vmem>>, %arg7: memref<128x128xbf16, #tpu.memory_space<vmem>>, %arg8: memref<1x128xf32, #tpu.memory_space<vmem>>, %arg9: memref<104x128xf32, #tpu.memory_space<vmem>>) attributes {dimension_semantics = [#tpu.dimension_semantics<parallel>], iteration_bounds = array<i64: 2>, scalar_prefetch = 1 : i64, scratch_operands = 0 : i64, tpu.core_type = #tpu.core_type<tc>, window_params = [{transform_indices = @transform_0, window_bounds = array<i64: 104, 200>}, {pipeline_mode = #tpu.pipeline_mode<synchronous>, transform_indices = @transform_1, window_bounds = array<i64: 200, 128>}, {pipeline_mode = #tpu.pipeline_mode<synchronous>, transform_indices = @transform_2, window_bounds = array<i64: 1, 128>}, {pipeline_mode = #tpu.pipeline_mode<synchronous>, transform_indices = @transform_3, window_bounds = array<i64: 128, 128>}, {pipeline_mode = #tpu.pipeline_mode<synchronous>, transform_indices = @transform_4, window_bounds = array<i64: 1, 128>}, {pipeline_mode = #tpu.pipeline_mode<synchronous>, transform_indices = @transform_5, window_bounds = array<i64: 128, 128>}, {pipeline_mode = #tpu.pipeline_mode<synchronous>, transform_indices = @transform_6, window_bounds = array<i64: 1, 128>}, {transform_indices = @transform_7, window_bounds = array<i64: 104, 128>}]} {
    %c0 = arith.constant 0 : index
    %c0_0 = arith.constant 0 : index
    %0 = vector.load %arg2[%c0, %c0_0] : memref<104x200xbf16, #tpu.memory_space<vmem>>, vector<104x200xbf16>
    %c0_1 = arith.constant 0 : index
    %c0_2 = arith.constant 0 : index
    %1 = vector.load %arg3[%c0_1, %c0_2] : memref<200x128xbf16, #tpu.memory_space<vmem>>, vector<200x128xbf16>
    %cst = arith.constant dense<0.000000e+00> : vector<104x128xf32>
    %2 = tpu.matmul %0, %1, %cst {dimension_numbers = #tpu.dot_dimension_numbers<[1], [0], [0], [1], [0, 0, 1, 1], [], []>} : vector<104x200xbf16>, vector<200x128xbf16>, vector<104x128xf32> -> vector<104x128xf32>
    %c0_3 = arith.constant 0 : index
    %c0_4 = arith.constant 0 : index
    %3 = vector.load %arg4[%c0_3, %c0_4] : memref<1x128xf32, #tpu.memory_space<vmem>>, vector<1x128xf32>
    %4 = vector.broadcast %3 : vector<1x128xf32> to vector<104x128xf32>
    %5 = arith.addf %2, %4 : vector<104x128xf32>
    %cst_5 = arith.constant 0.000000e+00 : f32
    %6 = vector.broadcast %cst_5 : f32 to vector<104x128xf32>
    %7 = arith.maximumf %5, %6 : vector<104x128xf32>
    %8 = arith.truncf %7 : vector<104x128xf32> to vector<104x128xbf16>
    %c0_6 = arith.constant 0 : index
    %c0_7 = arith.constant 0 : index
    %9 = vector.load %arg5[%c0_6, %c0_7] : memref<128x128xbf16, #tpu.memory_space<vmem>>, vector<128x128xbf16>
    %cst_8 = arith.constant dense<0.000000e+00> : vector<104x128xf32>
    %10 = tpu.matmul %8, %9, %cst_8 {dimension_numbers = #tpu.dot_dimension_numbers<[1], [0], [0], [1], [0, 0, 1, 1], [], []>} : vector<104x128xbf16>, vector<128x128xbf16>, vector<104x128xf32> -> vector<104x128xf32>
    %c0_9 = arith.constant 0 : index
    %c0_10 = arith.constant 0 : index
    %11 = vector.load %arg6[%c0_9, %c0_10] : memref<1x128xf32, #tpu.memory_space<vmem>>, vector<1x128xf32>
    %12 = vector.broadcast %11 : vector<1x128xf32> to vector<104x128xf32>
    %13 = arith.addf %10, %12 : vector<104x128xf32>
    %cst_11 = arith.constant 0.000000e+00 : f32
    %14 = vector.broadcast %cst_11 : f32 to vector<104x128xf32>
    %15 = arith.maximumf %13, %14 : vector<104x128xf32>
    %16 = arith.truncf %15 : vector<104x128xf32> to vector<104x128xbf16>
    %c0_12 = arith.constant 0 : index
    %c0_13 = arith.constant 0 : index
    %17 = vector.load %arg7[%c0_12, %c0_13] : memref<128x128xbf16, #tpu.memory_space<vmem>>, vector<128x128xbf16>
    %cst_14 = arith.constant dense<0.000000e+00> : vector<104x128xf32>
    %18 = tpu.matmul %16, %17, %cst_14 {dimension_numbers = #tpu.dot_dimension_numbers<[1], [0], [0], [1], [0, 0, 1, 1], [], []>} : vector<104x128xbf16>, vector<128x128xbf16>, vector<104x128xf32> -> vector<104x128xf32>
    %c0_15 = arith.constant 0 : index
    %c0_16 = arith.constant 0 : index
    %19 = vector.load %arg8[%c0_15, %c0_16] : memref<1x128xf32, #tpu.memory_space<vmem>>, vector<1x128xf32>
    %20 = vector.broadcast %19 : vector<1x128xf32> to vector<104x128xf32>
    %21 = arith.addf %18, %20 : vector<104x128xf32>
    %c0_17 = arith.constant 0 : index
    %c0_18 = arith.constant 0 : index
    %22 = vector.load %arg9[%c0_17, %c0_18] : memref<104x128xf32, #tpu.memory_space<vmem>>, vector<104x128xf32>
    tpu.vector_store %arg9[%c0_17, %c0_18], %21 {strides = array<i32>} : memref<104x128xf32, #tpu.memory_space<vmem>>, vector<104x128xf32>,
    return
  }
  func.func @transform_0(%arg0: i32, %arg1: memref<1xi32, #tpu.memory_space<smem>>) -> (i32, i32) {
    %c0_i32 = arith.constant 0 : i32
    %c0_i32_0 = arith.constant 0 : i32
    return %arg0, %c0_i32 : i32, i32
  }
  func.func @transform_1(%arg0: i32, %arg1: memref<1xi32, #tpu.memory_space<smem>>) -> (i32, i32) {
    %c0_i32 = arith.constant 0 : i32
    %c0_i32_0 = arith.constant 0 : i32
    %c0_i32_1 = arith.constant 0 : i32
    return %c0_i32, %c0_i32_0 : i32, i32
  }
  func.func @transform_2(%arg0: i32, %arg1: memref<1xi32, #tpu.memory_space<smem>>) -> (i32, i32) {
    %c0_i32 = arith.constant 0 : i32
    %c0_i32_0 = arith.constant 0 : i32
    %c0_i32_1 = arith.constant 0 : i32
    return %c0_i32, %c0_i32_0 : i32, i32
  }
  func.func @transform_3(%arg0: i32, %arg1: memref<1xi32, #tpu.memory_space<smem>>) -> (i32, i32) {
    %c0_i32 = arith.constant 0 : i32
    %c0_i32_0 = arith.constant 0 : i32
    %c0_i32_1 = arith.constant 0 : i32
    return %c0_i32, %c0_i32_0 : i32, i32
  }
  func.func @transform_4(%arg0: i32, %arg1: memref<1xi32, #tpu.memory_space<smem>>) -> (i32, i32) {
    %c0_i32 = arith.constant 0 : i32
    %c0_i32_0 = arith.constant 0 : i32
    %c0_i32_1 = arith.constant 0 : i32
    return %c0_i32, %c0_i32_0 : i32, i32
  }
  func.func @transform_5(%arg0: i32, %arg1: memref<1xi32, #tpu.memory_space<smem>>) -> (i32, i32) {
    %c0_i32 = arith.constant 0 : i32
    %c0_i32_0 = arith.constant 0 : i32
    %c0_i32_1 = arith.constant 0 : i32
    return %c0_i32, %c0_i32_0 : i32, i32
  }
  func.func @transform_6(%arg0: i32, %arg1: memref<1xi32, #tpu.memory_space<smem>>) -> (i32, i32) {
    %c0_i32 = arith.constant 0 : i32
    %c0_i32_0 = arith.constant 0 : i32
    %c0_i32_1 = arith.constant 0 : i32
    return %c0_i32, %c0_i32_0 : i32, i32
  }
  func.func @transform_7(%arg0: i32, %arg1: memref<1xi32, #tpu.memory_space<smem>>) -> (i32, i32) {
    %c0_i32 = arith.constant 0 : i32
    %c0_i32_0 = arith.constant 0 : i32
    return %arg0, %c0_i32 : i32, i32
  }
}

</mosaic_0001>

<bundles_post_ra>
// kernel: tpu_custom_call.1
= control target key start
LH: loop header
LB: loop body
LE: loop exit
PB: predicated region body
PF: predicated region fallthrough
CT: control target
= control target key end

     0   :  { %14 = vsyncpa [#allocation5], 0  ;;  %s1769_s0 = inlined_call_operand.<no memory space> [shape: s32[1], index: 0, kind: input, shape index: {}]   ;;  %s1770_s1 = inlined_call_operand.vmem [shape: bf16[208,200], index: 1, kind: input, shape index: {}]   ;;  %s1771_s2 = inlined_call_operand.vmem [shape: bf16[200,128], index: 2, kind: input, shape index: {}]   ;;  %s1772_s3 = inlined_call_operand.vmem [shape: f32[1,128], index: 3, kind: input, shape index: {}]   ;;  %s1773_s4 = inlined_call_operand.vmem [shape: bf16[128,128], index: 4, kind: input, shape index: {}]   ;;  %s1774_s5 = inlined_call_operand.vmem [shape: f32[1,128], index: 5, kind: input, shape index: {}]   ;;  %s1775_s6 = inlined_call_operand.vmem [shape: bf16[128,128], index: 6, kind: input, shape index: {}]   ;;  %s1776_s7 = inlined_call_operand.vmem [shape: f32[1,128], index: 7, kind: input, shape index: {}]   ;;  %s1777_s8 = inlined_call_operand.hbm [shape: f32[208,128], index: 8, kind: output, shape index: {}]  }
   0x1   :  { %16 = vsyncpa [#allocation5 + $0x1], 0  ;;  %s1434_s26 = smov 0   ;;  %s1436_s27 = smov 0  }
   0x2   :  { %s1438_s28 = smov 0   ;;  %s1440_s29 = smov 0  }
   0x3 LB: > { %s1455_s30 = sadd.s32 4294967295, %s1381_s29   ;;  %s1027_s9 = sadd.s32 4294967294, %s1381_s29   ;;  %s1381_s29 = sphi %s1440_s29, %s1783_s29   ;;  %s1377_s28 = sphi %s1438_s28, %s1782_s28   ;;  %s1373_s27 = sphi %s1436_s27, %s1781_s27   ;;  %s1369_s26 = sphi %s1434_s26, %s1780_s26  }
   0x4   : > { %s1459_s10 = sadd.s32 1, %s1381_s29   ;;  %s181_s11 = sadd.s32 1, %s1377_s28 }
   0x5   : > { %s178_s12 = ssub.s32 %s1381_s29, %s1459_s10  ;;  %p191_p0 = scmp.ne.s32.totalorder %s1377_s28, %s1373_s27 }
   0x6   : > { %p179_p1 = scmp.eq.s32.totalorder %s178_s12, 0  ;;  %p192_p2 = scmp.eq.s32.totalorder %s1455_s30, 1 }
   0x7   : > { %p197_p3 = scmp.ne.s32.totalorder %s1373_s27, %s1369_s26  ;;  %p198_p4 = scmp.eq.s32.totalorder %s1027_s9, 1 }
   0x8   : > { %s1470_s13 = scalar_select %p179_p1, %s1377_s28, %s181_s11  }
   0x9   : > { %p1472_p5 = por %p192_p2, %p191_p0  ;;  %p1476_p6 = por %p198_p4, %p197_p3 }
   0xa   : > { %p1030_p7 = scmp.ge.s32.totalorder %s1381_s29, 1  ;;  %p244_p8 = scmp.lt.s32.totalorder %s1381_s29, 3 }
   0xc   : > { %p245_p9 = pnand %p1030_p7, %p244_p8 }
   0xd   : > { %v1270_v0 = vld [vmem:[%s1771_s2] sm:$0xff] (!%p245_p9)   ;;  %v1383_v1 = vmov (!%p245_p9), 0   ;;  %v1271_v2 = vld [vmem:[%s1771_s2 + $0x8] sm:$0xff] (!%p245_p9)   ;;  %s277_s20 = smul.u32 (!%p245_p9), 13, %s1455_s30  ;;  %v1272_v3 = vld [vmem:[%s1771_s2 + $0x10] sm:$0xff] (!%p245_p9)   ;;  %v1384_v4 = vmov (!%p245_p9), 0.0  }
   0xe   : > { %248 = sbr.rel (%p245_p9) target bundleno = 783 (0x30f), region = 48  ;;  %492 = vmatprep.subr.bf16.mxu0 (!%p245_p9), %v1383_v1  ;;  %1209 = vmatprep.subr.bf16.mxu1 (!%p245_p9), %v1384_v4  ;;  %v1273_v5 = vld [vmem:[%s1771_s2 + $0x18] sm:$0xff] (!%p245_p9)   ;;  %vm466_vm0 = vcmask (!%p245_p9), 588800   ;;  %v1274_v7 = vld [vmem:[%s1771_s2 + $0x20] sm:$0xff] (!%p245_p9)   ;;  %v1275_v8 = vld [vmem:[%s1771_s2 + $0x28] sm:$0xff] (!%p245_p9)   ;;  %vm488_vm1 = vcmask (!%p245_p9), 1043456  }
   0xf   : > { %493 = vmatpush1.bf16.msra.mxu0 (!%p245_p9), %v1270_v0  ;;  %p278_p10 = scmp.lt.s32.totalorder (!%p245_p9), %s277_s20, 25  ;;  %v1303_v9 = vld [vmem:[%s1773_s4] sm:$0xff] (!%p245_p9)   ;;  %v1276_v10 = vld [vmem:[%s1771_s2 + $0x30] sm:$0xff] (!%p245_p9)   ;;  %v1304_v11 = vld [vmem:[%s1773_s4 + $0x8] sm:$0xff] (!%p245_p9)   ;;  %vm1385_vm2 = vmmov (!%p245_p9), 0   ;;  %s274_s12 = sand.u32 (!%p245_p9), 1, %s1373_s27  }
  0x10   : > { %494 = vmatprep.subr.bf16.mxu0 (!%p245_p9), %v1383_v1  ;;  %1217 = vmatpush3.bf16.msra.mxu1 (!%p245_p9), %v1303_v9  ;;  %v1277_v12 = vld [vmem:[%s1771_s2 + $0x38] sm:$0xff] (!%p245_p9)   ;;  %v1278_v13 = vld [vmem:[%s1771_s2 + $0x40] sm:$0xff] (!%p245_p9)   ;;  %v1305_v14 = vld [vmem:[%s1773_s4 + $0x10] sm:$0xff] (!%p245_p9)   ;;  %s1225_s16 = smul.u32 (!%p245_p9), 104, %s274_s12  ;;  %s1386_s24 = smov (!%p245_p9), [#allocation4]  }
  0x11   : > { %1210 = vmatprep.subr.bf16.mxu1 (!%p245_p9), %v1384_v4  ;;  %v1306_v15 = vld [vmem:[%s1773_s4 + $0x18] sm:$0xff] (!%p245_p9)   ;;  %v1279_v16 = vld [vmem:[%s1771_s2 + $0x48] sm:$0xff] (!%p245_p9)   ;;  %v1307_v17 = vld [vmem:[%s1773_s4 + $0x20] sm:$0xff] (!%p245_p9)   ;;  %1145 = vmatprep.mubr.msk.bf16.mxu1 (!%p245_p9), %vm1385_vm2, %v1384_v4  ;;  %s1323_s25 = sshll.u32 (!%p245_p9), %s1386_s24, 4  ;;  %s1324_s25 = int_to_ptr.vmem [resolvable:$false] %s1323_s25 }
  0x12   : > { %v1280_v18 = vld [vmem:[%s1771_s2 + $0x50] sm:$0xff] (!%p245_p9)   ;;  %v1308_v19 = vld [vmem:[%s1773_s4 + $0x28] sm:$0xff] (!%p245_p9)   ;;  %v1281_v20 = vld [vmem:[%s1771_s2 + $0x58] sm:$0xff] (!%p245_p9)   ;;  %s1702_s19 = scalar_lea.vmem (!%p245_p9), [#allocation4], %s1225_s16  ;;  %s1325_s9 = scalar_lea.vmem (!%p245_p9), %s1324_s25, 3328 }
  0x13   : > { %495 = vmatpush1.bf16.msra.mxu0 (!%p245_p9), %v1271_v2  ;;  %v1282_v21 = vld [vmem:[%s1771_s2 + $0x60] ss:$0 sps:$4 sm:$0xff] (!%p245_p9)   ;;  %v1309_v22 = vld [vmem:[%s1773_s4 + $0x30] sm:$0xff] (!%p245_p9)   ;;  %v1310_v38 = vld [vmem:[%s1773_s4 + $0x38] sm:$0xff] (!%p245_p9)   ;;  %s965_s21 = sshll.u32 (!%p245_p9), %s1702_s19, 4  ;;  %s1723_s21 = int_to_ptr.vmem [resolvable:$true] %s965_s21 }
  0x14   : > { %496 = vmatprep.subr.bf16.mxu0 (!%p245_p9), %v1383_v1  ;;  %1218 = vmatpush3.bf16.msra.mxu1 (!%p245_p9), %v1304_v11  ;;  %v490_v23 = vsel (!%p245_p9), %vm488_vm1, %v1282_v21, 0  ;;  %v1608_v39 = vld [vmem:[%s1772_s3] ss:$0 sm:$0xff] (!%p245_p9)  ;;  %s1319_s0 = scalar_lea.vmem (!%p245_p9), %s1723_s21, 1664  ;;  %p1326_p0 = scmp.lt.s32.totalorder (!%p245_p9), %s1723_s21, %s1324_s25 }
  0x15   : > { %s1785_s20 = smov (!%p278_p10, %s277_s20), 25  ;;  %1211 = vmatprep.subr.bf16.mxu1 %v1384_v4  ;;  %v1311_v2 = vld [vmem:[%s1775_s6] sm:$0xff]   ;;  %p1320_p11 = scmp.ne.s32.totalorder %s1723_s21, %s1319_s0 }
  0x16   : > { %s1089_s23 = sshll.u32 %s1785_s20, 3  ;;  %s1090_s20 = smul.u32 1664, %s1455_s30 }
  0x17   : > { %497 = vmatpush1.bf16.msra.mxu0 %v1272_v3  ;;  %s1502_s11 = scalar_lea.vmem %s1770_s1, %s1089_s23  ;;  %s1728_s30 = scalar_lea.sflag [#allocation5], %s274_s12 }
  0x18   : > { %498 = vmatprep.subr.bf16.mxu0 %v1383_v1  ;;  %v1285_v6 = vld [vmem:[%s1502_s11 + $0x4] ss:$8 sps:$4 sm:$0xff]   ;;  %1219 = vmatpush3.bf16.msra.mxu1 %v1305_v14  ;;  %v1283_v24 = vld [vmem:[%s1502_s11] ss:$8 sps:$4 sm:$0xff]   ;;  %v1286_v25 = vld [vmem:[%s1502_s11 + $0x14] ss:$8 sps:$4 sm:$0xff]   ;;  %s1721_s23 = scalar_lea.hbm %s1777_s8, %s1090_s20  ;;  %p1321_p12 = pnand %p1320_p11, %p1472_p5 }
  0x19   : > { %1061 = vmatprep.mubr.msk.bf16.mxu0 %vm466_vm0, %v1285_v6  ;;  %1212 = vmatprep.subr.bf16.mxu1 %v1384_v4  ;;  %v1288_v26 = vld [vmem:[%s1502_s11 + $0x10] ss:$8 sps:$4 sm:$0xff]   ;;  %v1289_v27 = vld [vmem:[%s1502_s11 + $0x24] ss:$8 sps:$4 sm:$0xff]   ;;  %v1291_v28 = vld [vmem:[%s1502_s11 + $0x20] ss:$8 sps:$4 sm:$0xff]   ;;  %p1327_p1 = scmp.lt.s32.totalorder %s1325_s9, %s1319_s0 }
  0x1a   : > { %v1292_v29 = vld [vmem:[%s1502_s11 + $0x34] ss:$8 sps:$4 sm:$0xff]   ;;  %v1294_v30 = vld [vmem:[%s1502_s11 + $0x30] ss:$8 sps:$4 sm:$0xff]   ;;  %v1295_v31 = vld [vmem:[%s1502_s11 + $0x44] ss:$8 sps:$4 sm:$0xff]   ;;  %p1322_p13 = pneg %p1321_p12 }
  0x1b   : > { %499 = vmatpush1.bf16.msra.mxu0 %v1273_v5  ;;  %v1297_v32 = vld [vmem:[%s1502_s11 + $0x40] ss:$8 sps:$4 sm:$0xff]   ;;  %v1298_v33 = vld [vmem:[%s1502_s11 + $0x54] ss:$8 sps:$4 sm:$0xff]   ;;  %v1300_v35 = vld [vmem:[%s1502_s11 + $0x50] ss:$8 sps:$4 sm:$0xff]   ;;  %p1328_p2 = por %p1327_p1, %p1326_p0 }
  0x1c   : > { %500 = vmatprep.subr.bf16.mxu0 %v1383_v1  ;;  %1220 = vmatpush3.bf16.msra.mxu1 %v1306_v15  ;;  %v298_v34 = vld [vmem:[%s1502_s11 + $0x60] sm:$0xff] }
  0x1d   : > { %1213 = vmatprep.subr.bf16.mxu1 %v1384_v4  ;;  %v1047_v36 = vcombine.high %v298_v34, %v298_v34  ;;  %v1046_v37 = vcombine.low %v298_v34, %v298_v34  ;;  %p1329_p3 = pnand %p1328_p2, %p1322_p13 }
  0x1f   : > { %501 = vmatpush1.bf16.msra.mxu0 %v1274_v7 }
  0x20   : > { %502 = vmatprep.subr.bf16.mxu0 %v1383_v1  ;;  %1221 = vmatpush3.bf16.msra.mxu1 %v1307_v17 }
  0x21   : > { %1214 = vmatprep.subr.bf16.mxu1 %v1384_v4 }
  0x23   : > { %503 = vmatpush1.bf16.msra.mxu0 %v1275_v8 }
  0x24   : > { %504 = vmatprep.subr.bf16.mxu0 %v1383_v1  ;;  %1222 = vmatpush3.bf16.msra.mxu1 %v1308_v19 }
  0x25   : > { %1215 = vmatprep.subr.bf16.mxu1 %v1384_v4 }
  0x27   : > { %505 = vmatpush1.bf16.msra.mxu0 %v1276_v10 }
  0x28   : > { %506 = vmatprep.subr.bf16.mxu0 %v1383_v1  ;;  %1223 = vmatpush3.bf16.msra.mxu1 %v1309_v22 }
  0x29   : > { %1216 = vmatprep.subr.bf16.mxu1 %v1384_v4 }
  0x2b   : > { %507 = vmatpush1.bf16.msra.mxu0 %v1277_v12 }
  0x2c   : > { %508 = vmatprep.subr.bf16.mxu0 %v1383_v1  ;;  %1224 = vmatpush3.bf16.msra.mxu1 %v1310_v38 }
  0x2d   : > { %1165 = vmatprep.subr.bf16.mxu1 %v1384_v4 }
  0x2f   : > { %509 = vmatpush1.bf16.msra.mxu0 %v1278_v13 }
  0x30   : > { %510 = vmatprep.subr.bf16.mxu0 %v1383_v1 }
  0x33   : > { %511 = vmatpush1.bf16.msra.mxu0 %v1279_v16 }
  0x34   : > { %512 = vmatprep.subr.bf16.mxu0 %v1383_v1 }
  0x37   : > { %513 = vmatpush1.bf16.msra.mxu0 %v1280_v18 }
  0x38   : > { %514 = vmatprep.subr.bf16.mxu0 %v1383_v1 }
  0x3b   : > { %515 = vmatpush1.bf16.msra.mxu0 %v1281_v20  ;;  %v1314_v20 = vld [vmem:[%s1775_s6 + $0x18] sm:$0xff]  }
  0x3c   : > { %516 = vmatprep.subr.bf16.mxu0 %v1383_v1 }
  0x3f   : > { %517 = vmatpush1.bf16.msra.mxu0 %v490_v23 }
  0x40   : > { %1121 = vmatprep.subr.bf16.mxu0 %v1384_v4 }
  0x42   : > { %525 = vmatmul.mubr.bf16.vlgmr.msra.gmra.mrb[0].mxu0 %v1283_v24 }
  0x43   : > { %1062 = vmatprep.mubr.msk.bf16.mxu0 %vm466_vm0, %v1286_v25  ;;  %1122 = vmatpush3.bf16.msra.mxu0 %v1303_v9  ;;  %v1312_v9 = vld [vmem:[%s1775_s6 + $0x8] sm:$0xff]   ;;  %v1315_v25 = vld [vmem:[%s1775_s6 + $0x20] sm:$0xff]  }
  0x44   : > { %1123 = vmatprep.subr.bf16.mxu0 %v1384_v4 }
  0x47   : > { %1124 = vmatpush3.bf16.msra.mxu0 %v1304_v11 }
  0x48   : > { %1125 = vmatprep.subr.bf16.mxu0 %v1384_v4 }
  0x4a   : > { %533 = vmatmul.mubr.bf16.gmra.mrb[4].mxu0 %v1288_v26 }
  0x4b   : > { %1063 = vmatprep.mubr.msk.bf16.mxu0 %vm466_vm0, %v1289_v27  ;;  %1126 = vmatpush3.bf16.msra.mxu0 %v1305_v14  ;;  %v1313_v14 = vld [vmem:[%s1775_s6 + $0x10] sm:$0xff]  }
  0x4c   : > { %1127 = vmatprep.subr.bf16.mxu0 %v1384_v4 }
  0x4f   : > { %1128 = vmatpush3.bf16.msra.mxu0 %v1306_v15 }
  0x50   : > { %1129 = vmatprep.subr.bf16.mxu0 %v1384_v4 }
  0x52   : > { %541 = vmatmul.mubr.bf16.gmra.mrb[8].mxu0 %v1291_v28 }
  0x53   : > { %1064 = vmatprep.mubr.msk.bf16.mxu0 %vm466_vm0, %v1292_v29  ;;  %1130 = vmatpush3.bf16.msra.mxu0 %v1307_v17 }
  0x54   : > { %1131 = vmatprep.subr.bf16.mxu0 %v1384_v4 }
  0x57   : > { %1132 = vmatpush3.bf16.msra.mxu0 %v1308_v19 }
  0x58   : > { %1133 = vmatprep.subr.bf16.mxu0 %v1384_v4 }
  0x5a   : > { %549 = vmatmul.mubr.bf16.gmra.mrb[12].mxu0 %v1294_v30 }
  0x5b   : > { %1065 = vmatprep.mubr.msk.bf16.mxu0 %vm466_vm0, %v1295_v31  ;;  %1134 = vmatpush3.bf16.msra.mxu0 %v1309_v22  ;;  %v1316_v31 = vld [vmem:[%s1775_s6 + $0x28] sm:$0xff]  }
  0x5c   : > { %1135 = vmatprep.subr.bf16.mxu0 %v1384_v4 }
  0x5f   : > { %1136 = vmatpush3.bf16.msra.mxu0 %v1310_v38 }
  0x62   : > { %557 = vmatmul.mubr.bf16.gmra.mrb[16].mxu0 %v1297_v32 }
  0x63   : > { %1066 = vmatprep.mubr.msk.bf16.mxu0 %vm466_vm0, %v1298_v33 }
  0x6a   : > { %565 = vmatmul.mubr.bf16.gmra.mrb[20].mxu0 %v1300_v35 }
  0x6b   : > { %1067 = vmatprep.mubr.msk.bf16.mxu0 %vm466_vm0, %v1047_v36  ;;  %v1317_v36 = vld [vmem:[%s1775_s6 + $0x30] sm:$0xff]  }
  0x72   : > { %573 = vmatmul.mubr.bf16.gmra.mrb[24].mxu0 %v1046_v37 }
  0x73   : > { %1137 = vmatprep.mubr.msk.bf16.mxu0 %vm1385_vm2, %v1384_v4 }
 0x115   : > { %v526_v40 = vpop.f32.mrb[0].mxu0 }
 0x116   : > { %v527_v41 = vadd.f32 %v1608_v39, %v526_v40  ;;  %v528_v42 = vpop.f32.mrb[1].mxu0 }
 0x117   : > { %v529_v43 = vpop.f32.mrb[2].mxu0 }
 0x118   : > { %v530_v44 = vadd.f32 %v1608_v39, %v529_v43  ;;  %v531_v45 = vpop.f32.mrb[3].mxu0  ;;  %v580_v46 = vmax.f32 %v527_v41, 0.0 }
 0x11a   : > { %v581_v47 = vmax.f32 %v530_v44, 0.0 }
 0x11c   : > { %v593_v48 = vpack.c.bf16 %v581_v47, %v580_v46  ;;  %v1669_v46 = vld [vmem:[%s1774_s5] ss:$0 sm:$0xff] }
 0x11d   : > { %v534_v49 = vpop.f32.mrb[4].mxu0 }
 0x11e   : > { %v535_v50 = vadd.f32 %v1608_v39, %v534_v49  ;;  %v536_v51 = vpop.f32.mrb[5].mxu0  ;;  %1138 = vmatmul.mubr.bf16.vlgmr.msra.gmra.mrb[28].mxu0 %v593_v48 }
 0x11f   : > { %v537_v52 = vpop.f32.mrb[6].mxu0  ;;  %1141 = vmatprep.mubr.msk.bf16.mxu0 %vm1385_vm2, %v1384_v4 }
 0x120   : > { %v538_v53 = vadd.f32 %v1608_v39, %v537_v52  ;;  %v539_v54 = vpop.f32.mrb[7].mxu0  ;;  %v582_v55 = vmax.f32 %v535_v50, 0.0 }
 0x122   : > { %v583_v56 = vmax.f32 %v538_v53, 0.0 }
 0x124   : > { %v594_v57 = vpack.c.bf16 %v583_v56, %v582_v55 }
 0x125   : > { %v542_v58 = vpop.f32.mrb[8].mxu0 }
 0x126   : > { %v543_v59 = vadd.f32 %v1608_v39, %v542_v58  ;;  %v544_v60 = vpop.f32.mrb[9].mxu0  ;;  %1142 = vmatmul.mubr.bf16.gmra.mrb[32].mxu0 %v594_v57 }
 0x127   : > { %v545_v61 = vpop.f32.mrb[10].mxu0 }
 0x128   : > { %v546_v62 = vadd.f32 %v1608_v39, %v545_v61  ;;  %v547_v63 = vpop.f32.mrb[11].mxu0  ;;  %v584_v0 = vmax.f32 %v543_v59, 0.0 }
 0x12a   : > { %v585_v1 = vmax.f32 %v546_v62, 0.0 }
 0x12c   : > { %v595_v3 = vpack.c.bf16 %v585_v1, %v584_v0 }
 0x12d   : > { %v550_v5 = vpop.f32.mrb[12].mxu0 }
 0x12e   : > { %v551_v6 = vadd.f32 %v1608_v39, %v550_v5  ;;  %v552_v7 = vpop.f32.mrb[13].mxu0  ;;  %1146 = vmatmul.mubr.bf16.vlgmr.msra.gmra.mrb[0].mxu1 %v595_v3 }
 0x12f   : > { %v553_v8 = vpop.f32.mrb[14].mxu0  ;;  %1149 = vmatprep.mubr.msk.bf16.mxu1 %vm1385_vm2, %v1384_v4  ;;  %1166 = vmatpush3.bf16.msra.mxu1 %v1311_v2 }
 0x130   : > { %v554_v10 = vadd.f32 %v1608_v39, %v553_v8  ;;  %v555_v11 = vpop.f32.mrb[15].mxu0  ;;  %1167 = vmatprep.subr.bf16.mxu1 %v1384_v4  ;;  %v586_v12 = vmax.f32 %v551_v6, 0.0 }
 0x132   : > { %v587_v13 = vmax.f32 %v554_v10, 0.0 }
 0x133   : > { %1168 = vmatpush3.bf16.msra.mxu1 %v1312_v9 }
 0x134   : > { %v596_v15 = vpack.c.bf16 %v587_v13, %v586_v12  ;;  %1169 = vmatprep.subr.bf16.mxu1 %v1384_v4 }
 0x135   : > { %v558_v16 = vpop.f32.mrb[16].mxu0 }
 0x136   : > { %v559_v17 = vadd.f32 %v1608_v39, %v558_v16  ;;  %v560_v18 = vpop.f32.mrb[17].mxu0  ;;  %1150 = vmatmul.mubr.bf16.gmra.mrb[4].mxu1 %v596_v15 }
 0x137   : > { %v561_v19 = vpop.f32.mrb[18].mxu0  ;;  %1153 = vmatprep.mubr.msk.bf16.mxu1 %vm1385_vm2, %v1384_v4  ;;  %1170 = vmatpush3.bf16.msra.mxu1 %v1313_v14 }
 0x138   : > { %v562_v21 = vadd.f32 %v1608_v39, %v561_v19  ;;  %v563_v22 = vpop.f32.mrb[19].mxu0  ;;  %1171 = vmatprep.subr.bf16.mxu1 %v1384_v4  ;;  %v588_v23 = vmax.f32 %v559_v17, 0.0 }
 0x13a   : > { %v589_v24 = vmax.f32 %v562_v21, 0.0 }
 0x13b   : > { %1172 = vmatpush3.bf16.msra.mxu1 %v1314_v20 }
 0x13c   : > { %v597_v26 = vpack.c.bf16 %v589_v24, %v588_v23  ;;  %1173 = vmatprep.subr.bf16.mxu1 %v1384_v4 }
 0x13d   : > { %v566_v27 = vpop.f32.mrb[20].mxu0 }
 0x13e   : > { %v567_v28 = vadd.f32 %v1608_v39, %v566_v27  ;;  %v568_v29 = vpop.f32.mrb[21].mxu0  ;;  %1154 = vmatmul.mubr.bf16.gmra.mrb[8].mxu1 %v597_v26 }
 0x13f   : > { %v569_v30 = vpop.f32.mrb[22].mxu0  ;;  %1157 = vmatprep.mubr.msk.bf16.mxu1 %vm1385_vm2, %v1384_v4  ;;  %1174 = vmatpush3.bf16.msra.mxu1 %v1315_v25 }
 0x140   : > { %v570_v32 = vadd.f32 %v1608_v39, %v569_v30  ;;  %v571_v33 = vpop.f32.mrb[23].mxu0  ;;  %1175 = vmatprep.subr.bf16.mxu1 %v1384_v4  ;;  %v590_v34 = vmax.f32 %v567_v28, 0.0 }
 0x142   : > { %v591_v35 = vmax.f32 %v570_v32, 0.0 }
 0x143   : > { %1176 = vmatpush3.bf16.msra.mxu1 %v1316_v31 }
 0x144   : > { %v598_v37 = vpack.c.bf16 %v591_v35, %v590_v34  ;;  %1177 = vmatprep.subr.bf16.mxu1 %v1384_v4 }
 0x145   : > { %v574_v38 = vpop.f32.mrb[24].mxu0 }
 0x146   : > { %v575_v40 = vadd.f32 %v1608_v39, %v574_v38  ;;  %1158 = vmatmul.mubr.bf16.gmra.mrb[12].mxu1 %v598_v37  ;;  %v576_v41 = vpop.f32.mrb[25].mxu0  ;;  %v1318_v39 = vld [vmem:[%s1775_s6 + $0x38] sm:$0xff]  }
 0x147   : > { %v577_v42 = vpop.f32.mrb[26].mxu0  ;;  %1161 = vmatprep.mubr.msk.bf16.mxu1 %vm1385_vm2, %v1384_v4  ;;  %1178 = vmatpush3.bf16.msra.mxu1 %v1317_v36 }
 0x148   : > { %v592_v43 = vmax.f32 %v575_v40, 0.0  ;;  %v578_v44 = vpop.f32.mrb[27].mxu0  ;;  %1179 = vmatprep.subr.bf16.mxu1 %v1384_v4 }
 0x14a   : > { %v599_v45 = vpack.c.bf16 %v592_v43, %v592_v43 }
 0x14b   : > { %1180 = vmatpush3.bf16.msra.mxu1 %v1318_v39  ;;  %v1077_v39 = vld [vmem:[%s1776_s7] ss:$0 sm:$0xff] }
 0x14e   : > { %1162 = vmatmul.mubr.bf16.gmra.mrb[16].mxu1 %v599_v45 }
 0x14f   : > { %1181 = vmatprep.mubr.msk.bf16.mxu1 %vm1385_vm2, %v1384_v4 }
 0x1f1   : > { %v705_v47 = vpop.f32.mrb[28].mxu0 }
 0x1f2   : > { %v706_v48 = vadd.f32 %v1669_v46, %v705_v47  ;;  %v1139_v49 = vpop.f32.mrb[29].mxu0 }
 0x1f3   : > { %v708_v50 = vpop.f32.mrb[30].mxu0 }
 0x1f4   : > { %v709_v51 = vadd.f32 %v1669_v46, %v708_v50  ;;  %v1140_v52 = vpop.f32.mrb[31].mxu0  ;;  %v759_v53 = vmax.f32 %v706_v48, 0.0 }
 0x1f6   : > { %v760_v54 = vmax.f32 %v709_v51, 0.0 }
 0x1f8   : > { %v772_v55 = vpack.c.bf16 %v760_v54, %v759_v53 }
 0x1f9   : > { %v713_v56 = vpop.f32.mrb[32].mxu0 }
 0x1fa   : > { %v714_v57 = vadd.f32 %v1669_v46, %v713_v56  ;;  %v1143_v58 = vpop.f32.mrb[33].mxu0  ;;  %1182 = vmatmul.mubr.bf16.vlgmr.msra.gmra.mrb[20].mxu1 %v772_v55 }
 0x1fb   : > { %v716_v59 = vpop.f32.mrb[34].mxu0  ;;  %1185 = vmatprep.mubr.msk.bf16.mxu1 %vm1385_vm2, %v1384_v4 }
 0x1fc   : > { %v717_v60 = vadd.f32 %v1669_v46, %v716_v59  ;;  %v1144_v61 = vpop.f32.mrb[35].mxu0  ;;  %v761_v62 = vmax.f32 %v714_v57, 0.0 }
 0x1fe   : > { %v762_v63 = vmax.f32 %v717_v60, 0.0 }
 0x200   : > { %v773_v0 = vpack.c.bf16 %v762_v63, %v761_v62 }
 0x201   : > { %v721_v1 = vpop.f32.mrb[0].mxu1 }
 0x202   : > { %v722_v2 = vadd.f32 %v1669_v46, %v721_v1  ;;  %v1147_v3 = vpop.f32.mrb[1].mxu1  ;;  %1186 = vmatmul.mubr.bf16.gmra.mrb[24].mxu1 %v773_v0 }
 0x203   : > { %v724_v5 = vpop.f32.mrb[2].mxu1  ;;  %1189 = vmatprep.mubr.msk.bf16.mxu1 %vm1385_vm2, %v1384_v4 }
 0x204   : > { %v725_v6 = vadd.f32 %v1669_v46, %v724_v5  ;;  %v1148_v7 = vpop.f32.mrb[3].mxu1  ;;  %v763_v8 = vmax.f32 %v722_v2, 0.0 }
 0x206   : > { %v764_v9 = vmax.f32 %v725_v6, 0.0 }
 0x208   : > { %v774_v10 = vpack.c.bf16 %v764_v9, %v763_v8 }
 0x209   : > { %v729_v11 = vpop.f32.mrb[4].mxu1 }
 0x20a   : > { %v730_v12 = vadd.f32 %v1669_v46, %v729_v11  ;;  %v1151_v13 = vpop.f32.mrb[5].mxu1  ;;  %1190 = vmatmul.mubr.bf16.gmra.mrb[28].mxu1 %v774_v10 }
 0x20b   : > { %v732_v14 = vpop.f32.mrb[6].mxu1  ;;  %1193 = vmatprep.mubr.msk.bf16.mxu1 %vm1385_vm2, %v1384_v4 }
 0x20c   : > { %v733_v15 = vadd.f32 %v1669_v46, %v732_v14  ;;  %v1152_v16 = vpop.f32.mrb[7].mxu1  ;;  %v765_v17 = vmax.f32 %v730_v12, 0.0 }
 0x20e   : > { %v766_v18 = vmax.f32 %v733_v15, 0.0 }
 0x210   : > { %v775_v19 = vpack.c.bf16 %v766_v18, %v765_v17 }
 0x211   : > { %v737_v20 = vpop.f32.mrb[8].mxu1 }
 0x212   : > { %v738_v21 = vadd.f32 %v1669_v46, %v737_v20  ;;  %v1155_v22 = vpop.f32.mrb[9].mxu1  ;;  %1194 = vmatmul.mubr.bf16.gmra.mrb[32].mxu1 %v775_v19 }
 0x213   : > { %v740_v23 = vpop.f32.mrb[10].mxu1  ;;  %1197 = vmatprep.mubr.msk.bf16.mxu1 %vm1385_vm2, %v1384_v4 }
 0x214   : > { %v741_v24 = vadd.f32 %v1669_v46, %v740_v23  ;;  %v1156_v25 = vpop.f32.mrb[11].mxu1  ;;  %v767_v26 = vmax.f32 %v738_v21, 0.0 }
 0x216   : > { %v768_v27 = vmax.f32 %v741_v24, 0.0 }
 0x218   : > { %v776_v28 = vpack.c.bf16 %v768_v27, %v767_v26 }
 0x219   : > { %v745_v29 = vpop.f32.mrb[12].mxu1 }
 0x21a   : > { %v746_v30 = vadd.f32 %v1669_v46, %v745_v29  ;;  %v1159_v31 = vpop.f32.mrb[13].mxu1  ;;  %1198 = vmatmul.mubr.bf16.gmra.mrb[36].mxu1 %v776_v28 }
 0x21b   : > { %v748_v32 = vpop.f32.mrb[14].mxu1  ;;  %1201 = vmatprep.mubr.msk.bf16.mxu1 %vm1385_vm2, %v1384_v4 }
 0x21c   : > { %v749_v33 = vadd.f32 %v1669_v46, %v748_v32  ;;  %v1160_v34 = vpop.f32.mrb[15].mxu1  ;;  %v769_v35 = vmax.f32 %v746_v30, 0.0 }
 0x21e   : > { %v770_v36 = vmax.f32 %v749_v33, 0.0 }
 0x220   : > { %v777_v37 = vpack.c.bf16 %v770_v36, %v769_v35 }
 0x221   : > { %v753_v38 = vpop.f32.mrb[16].mxu1 }
 0x222   : > { %v754_v40 = vadd.f32 %v1669_v46, %v753_v38  ;;  %v1163_v41 = vpop.f32.mrb[17].mxu1  ;;  %1202 = vmatmul.mubr.bf16.gmra.mrb[40].mxu1 %v777_v37 }
 0x223   : > { %v756_v42 = vpop.f32.mrb[18].mxu1  ;;  %1205 = vmatprep.mubr.msk.bf16.mxu1 %vm1385_vm2, %v1384_v4 }
 0x224   : > { %v771_v43 = vmax.f32 %v754_v40, 0.0  ;;  %v1164_v44 = vpop.f32.mrb[19].mxu1 }
 0x226   : > { %v778_v45 = vpack.c.bf16 %v771_v43, %v771_v43 }
 0x22a   : > { %1206 = vmatmul.mubr.bf16.gmra.mrb[44].mxu1 %v778_v45 }
 0x2cd   : > { %v884_v47 = vpop.f32.mrb[20].mxu1 }
 0x2ce   : > { %v885_v48 = vadd.f32 %v1077_v39, %v884_v47  ;;  %v1183_v46 = vpop.f32.mrb[21].mxu1 }
 0x2cf   : > { %v887_v49 = vpop.f32.mrb[22].mxu1 }
 0x2d0   : > { %938 = vst [vmem:[%s1702_s19] sm:$0xff] %v885_v48  ;;  %v888_v4 = vadd.f32 %v1077_v39, %v887_v49  ;;  %v1184_v50 = vpop.f32.mrb[23].mxu1 }
 0x2d2   : > { %939 = vst [vmem:[%s1702_s19 + $0x8] sm:$0xff] %v888_v4 }
 0x2d5   : > { %v892_v51 = vpop.f32.mrb[24].mxu1 }
 0x2d6   : > { %v893_v52 = vadd.f32 %v1077_v39, %v892_v51  ;;  %v1187_v53 = vpop.f32.mrb[25].mxu1 }
 0x2d7   : > { %v895_v54 = vpop.f32.mrb[26].mxu1 }
 0x2d8   : > { %940 = vst [vmem:[%s1702_s19 + $0x10] sm:$0xff] %v893_v52  ;;  %v896_v55 = vadd.f32 %v1077_v39, %v895_v54  ;;  %v1188_v56 = vpop.f32.mrb[27].mxu1 }
 0x2da   : > { %941 = vst [vmem:[%s1702_s19 + $0x18] sm:$0xff] %v896_v55 }
 0x2dd   : > { %v900_v57 = vpop.f32.mrb[28].mxu1 }
 0x2de   : > { %v901_v58 = vadd.f32 %v1077_v39, %v900_v57  ;;  %v1191_v59 = vpop.f32.mrb[29].mxu1 }
 0x2df   : > { %v903_v60 = vpop.f32.mrb[30].mxu1 }
 0x2e0   : > { %942 = vst [vmem:[%s1702_s19 + $0x20] sm:$0xff] %v901_v58  ;;  %v904_v61 = vadd.f32 %v1077_v39, %v903_v60  ;;  %v1192_v62 = vpop.f32.mrb[31].mxu1 }
 0x2e2   : > { %943 = vst [vmem:[%s1702_s19 + $0x28] sm:$0xff] %v904_v61 }
 0x2e5   : > { %v908_v63 = vpop.f32.mrb[32].mxu1 }
 0x2e6   : > { %v909_v0 = vadd.f32 %v1077_v39, %v908_v63  ;;  %v1195_v1 = vpop.f32.mrb[33].mxu1 }
 0x2e7   : > { %v911_v2 = vpop.f32.mrb[34].mxu1 }
 0x2e8   : > { %944 = vst [vmem:[%s1702_s19 + $0x30] sm:$0xff] %v909_v0  ;;  %v912_v3 = vadd.f32 %v1077_v39, %v911_v2  ;;  %v1196_v5 = vpop.f32.mrb[35].mxu1 }
 0x2ea   : > { %945 = vst [vmem:[%s1702_s19 + $0x38] sm:$0xff] %v912_v3 }
 0x2ed   : > { %v916_v6 = vpop.f32.mrb[36].mxu1 }
 0x2ee   : > { %v917_v7 = vadd.f32 %v1077_v39, %v916_v6  ;;  %v1199_v8 = vpop.f32.mrb[37].mxu1 }
 0x2ef   : > { %v919_v9 = vpop.f32.mrb[38].mxu1 }
 0x2f0   : > { %946 = vst [vmem:[%s1702_s19 + $0x40] sm:$0xff] %v917_v7  ;;  %v920_v10 = vadd.f32 %v1077_v39, %v919_v9  ;;  %v1200_v11 = vpop.f32.mrb[39].mxu1 }
 0x2f2   : > { %947 = vst [vmem:[%s1702_s19 + $0x48] sm:$0xff] %v920_v10 }
 0x2f5   : > { %v924_v12 = vpop.f32.mrb[40].mxu1 }
 0x2f6   : > { %v925_v13 = vadd.f32 %v1077_v39, %v924_v12  ;;  %v1203_v14 = vpop.f32.mrb[41].mxu1 }
 0x2f7   : > { %v927_v15 = vpop.f32.mrb[42].mxu1 }
 0x2f8   : > { %948 = vst [vmem:[%s1702_s19 + $0x50] sm:$0xff] %v925_v13  ;;  %v928_v16 = vadd.f32 %v1077_v39, %v927_v15  ;;  %v1204_v17 = vpop.f32.mrb[43].mxu1 }
 0x2fa   : > { %949 = vst [vmem:[%s1702_s19 + $0x58] sm:$0xff] %v928_v16 }
 0x2fd   : > { %v932_v18 = vpop.f32.mrb[44].mxu1 }
 0x2fe   : > { %v933_v19 = vadd.f32 %v1077_v39, %v932_v18  ;;  %v1207_v20 = vpop.f32.mrb[45].mxu1 }
 0x2ff   : > { %v935_v21 = vpop.f32.mrb[46].mxu1 }
 0x300   : > { %950 = vst [vmem:[%s1702_s19 + $0x60] sm:$0xff] %v933_v19  ;;  %v1208_v22 = vpop.f32.mrb[47].mxu1 }
 0x301   : > { %1332 = shalt.err (!%p1329_p3)
}
 0x302   : > { %s1333_s12 = scalar_lea.hbm %s1721_s23, 1664  ;;  %s1337_s18 = scalar_lea.hbm %s1777_s8, 3328 }
 0x303   : > { %p1334_p4 = scmp.ne.s32.totalorder %s1721_s23, %s1333_s12  ;;  %p1338_p9 = scmp.lt.u32.totalorder %s1721_s23, %s1777_s8 }
 0x304   : > { %p1339_p10 = scmp.lt.u32.totalorder %s1337_s18, %s1333_s12  ;;  %p1341_p12 = scmp.lt.u32.totalorder %s1333_s12, %s1721_s23 }
 0x305   : > { %p1335_p7 = pnand %p1334_p4, %p1472_p5 }
 0x306   : > { %p1340_p11 = por %p1339_p10, %p1338_p9 }
 0x307   : > { %p1336_p8 = pneg %p1335_p7 }
 0x308   : > { %p1342_p13 = por %p1341_p12, %p1340_p11 }
 0x30a   : > { %p1343_p0 = pnand %p1342_p13, %p1336_p8 }
 0x30c   : > { %1346 = shalt.err (!%p1343_p0)
}
 0x30d   : > { %s1387_s22 = smov 128   ;;  %s1388_s11 = smov 8  }
 0x30e   : > { %1226 = dma.vmem_to_hbm [thread:$0]  (%p1472_p5), %s1723_s21, 1664, %s1721_s23, %s1728_s30, %s1387_s22, %s1387_s22, %s1388_s11  }
 0x30f PF: > { %p1232_p1 = scmp.ge.s32.totalorder %s1381_s29, 2  ;;  %s980_s0 = sand.u32 1, %s1369_s26  }
 0x310   : > { %s981_s24 = scalar_lea.sflag [#allocation5], %s980_s0 }
 0x311   : > { %p1229_p2 = pnand %p1232_p1, %p1476_p6 }
 0x313   : > { %1364 = dma.done.wait (!%p1229_p2), %s981_s24, 1664  }
 0x314   : > { %1366 = vsyncadd (!%p1229_p2), %s981_s24, 4294965632  ;;  %p19_p3 = scmp.ge.s32.totalorder %s1459_s10, 4   ;;  %s1780_s26 = smov %s1373_s27 }
 0x315   : > { %s1781_s27 = smov %s1377_s28  ;;  %s1782_s28 = smov %s1470_s13 }
 0x316   : > { %s1783_s29 = smov %s1459_s10  ;;  %21 = sbr.rel (!%p19_p3) target bundleno = 3 (0x3), region = 83 }
 0x31d   :  { %986 = vsyncpa [#allocation5], 1 }
 0x31e   :  { %988 = vsyncpa [#allocation5 + $0x1], 1 }

</bundles_post_ra>
